<compile_context>
chip_gen: v7x
topology: tpu7x:2x2x1
jax: 0.10.0
libtpu: 0.0.40
codegen_flags: <defaults>
</compile_context>

<pallas_src>
import functools

import jax
import jax.numpy as jnp
from jax.experimental import pallas as pl
from jax.experimental.pallas import tpu as pltpu


def _round_up(x, m):
    return ((x + m - 1) // m) * m


_TK_MAX = 4608                      # largest K in this model (3*3*512) -> single block
_VMEM_LIMIT = 48 * 1024 * 1024      # safe on v5e/v6e (128 MiB phys) and v7x (64 MiB)


def _is_v7x():
    try:
        kind = jax.devices()[0].device_kind.lower()
    except Exception:
        return False
    return ("v7" in kind) or ("tpu7" in kind)


_N_CORES = 2 if _is_v7x() else 1


def _choose_k_tiling(K):
    """Pad K to a 128 multiple; take it as a single full block when it fits,
    otherwise split into equal 128-aligned tiles (padded zeros are harmless)."""
    Kp = _round_up(K, 128)
    if Kp <= _TK_MAX:
        return Kp, Kp, 1
    steps = -(-Kp // _TK_MAX)
    tk = _round_up(-(-Kp // steps), 128)
    return tk * steps, tk, steps


def _choose_m_tiling(M):
    """Single full-M block (16-aligned for bf16 sublane pairs) for small M;
    256-row tiles for large M."""
    if M <= 512:
        tm = _round_up(M, 16)
    else:
        tm = 256
    return _round_up(M, tm), tm


def _choose_n_tiling(Np):
    """Split the output-channel axis across v7x's two TensorCores on wide
    layers; single lane-dense block on single-core chips (v5e/v6e)."""
    if _N_CORES > 1 and Np >= 256:
        return Np // 2, 2
    return Np, 1


# ----------------------------- Pallas kernels -------------------------------- #
def _conv_bn_kernel_single_k(p_ref, w_ref, s_ref, b_ref, *rest, relu, has_residual):
    """Single full-K block: one (TM, TN) output tile per grid step, no revisit."""
    if has_residual:
        r_ref, o_ref = rest
    else:
        (o_ref,) = rest
    acc = jnp.dot(p_ref[...], w_ref[...], preferred_element_type=jnp.float32)
    y = acc * s_ref[...] + b_ref[...]
    if has_residual:
        y = y + r_ref[...].astype(jnp.float32)
    if relu:
        y = jnp.maximum(y, 0.0)
    o_ref[...] = y.astype(o_ref.dtype)


def _conv_bn_kernel_multi_k(p_ref, w_ref, s_ref, b_ref, *rest, relu, has_residual):
    """Fallback when K does not fit one block: f32 VMEM accumulator, K last."""
    if has_residual:
        r_ref, o_ref, acc_ref = rest
    else:
        o_ref, acc_ref = rest
    k = pl.program_id(2)

    @pl.when(k == 0)
    def _():
        acc_ref[...] = jnp.zeros_like(acc_ref)

    acc_ref[...] += jnp.dot(p_ref[...], w_ref[...],
                            preferred_element_type=jnp.float32)

    @pl.when(k == pl.num_programs(2) - 1)
    def _():
        y = acc_ref[...] * s_ref[...] + b_ref[...]
        if has_residual:
            y = y + r_ref[...].astype(jnp.float32)
        if relu:
            y = jnp.maximum(y, 0.0)
        o_ref[...] = y.astype(o_ref.dtype)


def fused_conv_bn_matmul(patches, w, scale, bias, cout, residual=None, relu=False):
    """patches: (M, K) bf16; w: (Kp, Np) bf16 pre-padded at init;
    scale/bias: (1, Np) f32 pre-padded; residual: (M, cout) bf16 or None.
    Returns (M, cout) bf16."""
    M, K = patches.shape
    Kp, Np = w.shape
    Kp2, TK, k_steps = _choose_k_tiling(K)
    assert Kp2 == Kp, (Kp2, Kp)
    Mp, TM = _choose_m_tiling(M)
    TN, n_steps = _choose_n_tiling(Np)

    p = patches
    if (Mp, Kp) != (M, K):
        p = jnp.pad(p, ((0, Mp - M), (0, Kp - K)))

    has_residual = residual is not None
    rp = None
    if has_residual:
        rp = residual
        if (Mp, Np) != residual.shape:
            rp = jnp.pad(residual,
                         ((0, Mp - M), (0, Np - residual.shape[1])))

    cost = pl.CostEstimate(
        flops=2 * M * K * cout,
        transcendentals=0,
        bytes_accessed=(p.size * 2 + w.size * 2 + Mp * Np * 2
                        + (Mp * Np * 2 if has_residual else 0)),
    )

    args = [p, w, scale, bias]
    if k_steps == 1:
        in_specs = [
            pl.BlockSpec((TM, Kp), lambda m, n: (m, 0)),   # patches
            pl.BlockSpec((Kp, TN), lambda m, n: (0, n)),   # weights
            pl.BlockSpec((1, TN), lambda m, n: (0, n)),    # bn scale
            pl.BlockSpec((1, TN), lambda m, n: (0, n)),    # bn bias (+conv bias)
        ]
        if has_residual:
            in_specs.append(pl.BlockSpec((TM, TN), lambda m, n: (m, n)))
            args.append(rp)
        grid = (Mp // TM, n_steps)
        out_specs = pl.BlockSpec((TM, TN), lambda m, n: (m, n))
        kernel = functools.partial(_conv_bn_kernel_single_k,
                                   relu=relu, has_residual=has_residual)
        scratch_shapes = ()
        semantics = ("parallel", "parallel")
    else:
        in_specs = [
            pl.BlockSpec((TM, TK), lambda m, n, k: (m, k)),
            pl.BlockSpec((TK, TN), lambda m, n, k: (k, n)),
            pl.BlockSpec((1, TN), lambda m, n, k: (0, n)),
            pl.BlockSpec((1, TN), lambda m, n, k: (0, n)),
        ]
        if has_residual:
            in_specs.append(pl.BlockSpec((TM, TN), lambda m, n, k: (m, n)))
            args.append(rp)
        grid = (Mp // TM, n_steps, k_steps)
        out_specs = pl.BlockSpec((TM, TN), lambda m, n, k: (m, n))
        kernel = functools.partial(_conv_bn_kernel_multi_k,
                                   relu=relu, has_residual=has_residual)
        scratch_shapes = (pltpu.VMEM((TM, TN), jnp.float32),)
        semantics = ("parallel", "parallel", "arbitrary")

    out = pl.pallas_call(
        kernel,
        out_shape=jax.ShapeDtypeStruct((Mp, Np), jnp.bfloat16),
        grid_spec=pltpu.PrefetchScalarGridSpec(
            num_scalar_prefetch=0,
            grid=grid,
            in_specs=in_specs,
            out_specs=out_specs,
            scratch_shapes=scratch_shapes,
        ),
        compiler_params=pltpu.CompilerParams(
            dimension_semantics=semantics,
            vmem_limit_bytes=_VMEM_LIMIT),
        cost_estimate=cost,
    )(*args)
    return out[:M, :cout]


# ------------------------------ JAX glue ------------------------------------ #
def _im2col(x, kh, kw, sh, sw, ph, pw):
    """x: (N, H, W, C) bf16 -> (N*OH*OW, kh*kw*C) patches, tap-major/channel-minor."""
    N, H, W, C = x.shape
    xp = jnp.pad(x, ((0, 0), (ph, ph), (pw, pw), (0, 0)))
    OH = (H + 2 * ph - kh) // sh + 1
    OW = (W + 2 * pw - kw) // sw + 1
    cols = []
    for i in range(kh):
        for j in range(kw):
            cols.append(xp[:, i:i + sh * (OH - 1) + 1:sh,
                           j:j + sw * (OW - 1) + 1:sw, :])
    p = jnp.stack(cols, axis=3)  # (N, OH, OW, kh*kw, C)
    return p.reshape(N * OH * OW, kh * kw * C), OH, OW


def conv_bn(x, params, k, stride, pad, residual=None, relu=False):
    """Conv2d(k, stride, pad) + folded BN [+ residual add] [+ ReLU] on NHWC bf16."""
    sh, sw = stride
    patches, OH, OW = _im2col(x, k, k, sh, sw, pad, pad)
    N = x.shape[0]
    cout = params["cout"]
    res_flat = None
    if residual is not None:
        res_flat = residual.reshape(N * OH * OW, residual.shape[-1])
    out = fused_conv_bn_matmul(patches, params["w"], params["scale"],
                               params["bias"], cout, res_flat, relu)
    return out.reshape(N, OH, OW, cout)


# --------------------------- parameter init ---------------------------------- #
def _init_conv_bn(key, c_in, c_out, k):
    kw_key, kb_key, g_key, be_key = jax.random.split(key, 4)
    fan_in = c_in * k * k
    w = jax.random.normal(kw_key, (k, k, c_in, c_out), jnp.float32) * (0.5 / jnp.sqrt(fan_in))
    conv_b = jax.random.normal(kb_key, (c_out,), jnp.float32) * 0.01
    gamma = 1.0 + 0.1 * jax.random.normal(g_key, (c_out,), jnp.float32)
    beta = 0.05 * jax.random.normal(be_key, (c_out,), jnp.float32)
    run_mean = jnp.zeros((c_out,), jnp.float32)
    run_var = jnp.ones((c_out,), jnp.float32)
    eps = 1e-5
    scale = gamma / jnp.sqrt(run_var + eps)
    bias = beta + (conv_b - run_mean) * scale

    # Hoisted, forward-invariant padding + bf16 cast of the matmul operands.
    K = k * k * c_in
    Kp, _, _ = _choose_k_tiling(K)
    Np = _round_up(c_out, 128)
    w2 = w.reshape(K, c_out)
    w2 = jnp.pad(w2, ((0, Kp - K), (0, Np - c_out))).astype(jnp.bfloat16)
    scale_p = jnp.pad(scale, (0, Np - c_out)).reshape(1, Np)
    bias_p = jnp.pad(bias, (0, Np - c_out)).reshape(1, Np)
    return {"w": w2, "scale": scale_p, "bias": bias_p, "cout": c_out}


def _init_res_block(key, c_in, c_out, stride):
    if isinstance(stride, tuple):
        sh, sw = stride
        flag = stride[0] > 1
    else:
        sh, sw = stride, stride
        flag = stride > 1
    k1, k2, k3 = jax.random.split(key, 3)
    blk = {"stride": (sh, sw), "flag": flag}
    if flag:
        blk["conv1"] = _init_conv_bn(k1, c_in, c_out, 3)
        blk["downsample"] = _init_conv_bn(k3, c_in, c_out, 3)
    else:
        blk["conv1"] = _init_conv_bn(k1, c_in, c_out, 1)
        blk["downsample"] = None
    blk["conv2"] = _init_conv_bn(k2, c_out, c_out, 3)
    return blk


def _make_layer(key, c_in, c_out, stride, repeat):
    keys = jax.random.split(key, repeat)
    blocks = [_init_res_block(keys[0], c_in, c_out, stride)]
    for i in range(repeat - 1):
        blocks.append(_init_res_block(keys[i + 1], c_out, c_out, 1))
    return blocks


def init_resnet(key, c_in):
    ks = jax.random.split(key, 6)
    return {
        "block0": _init_conv_bn(ks[0], c_in, 64, 7),
        "block1": _make_layer(ks[1], 64, 128, (2, 2), 2),
        "block2": _make_layer(ks[2], 128, 256, (2, 2), 2),
        "block3": _make_layer(ks[3], 256, 512, (2, 2), 2),
        "block4": _make_layer(ks[4], 512, 512, (2, 1), 2),
        "block5": _make_layer(ks[5], 512, 512, (3, 1), 1),
    }


# ------------------------------- forward ------------------------------------- #
def res_block_fwd(x, bp):
    sh, sw = bp["stride"]
    if bp["flag"]:
        c1 = conv_bn(x, bp["conv1"], 3, (sh, sw), 1, relu=False)
        res = conv_bn(x, bp["downsample"], 3, (sh, sw), 1, relu=False)
    else:
        c1 = conv_bn(x, bp["conv1"], 1, (sh, sw), 0, relu=False)
        res = x
    # conv2 + BN + residual add + ReLU fused into one Pallas kernel call.
    return conv_bn(c1, bp["conv2"], 3, (1, 1), 1, residual=res, relu=True)


def resnet_fwd(x_nchw, params):
    x = jnp.transpose(x_nchw, (0, 2, 3, 1)).astype(jnp.bfloat16)  # NCHW f32 -> NHWC bf16
    h = conv_bn(x, params["block0"], 7, (1, 1), 1, relu=False)
    for name in ("block1", "block2", "block3", "block4", "block5"):
        for bp in params[name]:
            h = res_block_fwd(h, bp)
    return jnp.transpose(h, (0, 3, 1, 2)).astype(jnp.float32)  # back to NCHW f32


# --------------------------------- main --------------------------------------- #
if __name__ == "__main__":
    c_in = 1
    x = jax.random.normal(jax.random.PRNGKey(0), (2, c_in, 16, 16), jnp.float32)
    params = init_resnet(jax.random.PRNGKey(42), c_in)

    out = resnet_fwd(x, params)
    out = jax.block_until_ready(out)

    # Expected output shape for 16x16 input: (2, 512, 1, 2)
    assert out.shape == (2, 512, 1, 2), out.shape
    assert bool(jnp.all(jnp.isfinite(out)))
    print("KERNEL_OK")
</pallas_src>

<mosaic_0001>
module attributes {stable_mosaic.version = 11 : i64} {
  func.func @_conv_bn_kernel_single_k(%arg0: i32, %arg1: i32, %arg2: memref<288x128xbf16, #tpu.memory_space<vmem>>, %arg3: memref<128x128xbf16, #tpu.memory_space<vmem>>, %arg4: memref<1x128xf32, #tpu.memory_space<vmem>>, %arg5: memref<1x128xf32, #tpu.memory_space<vmem>>, %arg6: memref<288x128xbf16, #tpu.memory_space<vmem>>) attributes {dimension_semantics = [#tpu.dimension_semantics<parallel>, #tpu.dimension_semantics<parallel>], iteration_bounds = array<i64: 1, 1>, scalar_prefetch = 0 : i64, scratch_operands = 0 : i64, tpu.core_type = #tpu.core_type<tc>, window_params = [{transform_indices = @transform_0, window_bounds = array<i64: 288, 128>}, {transform_indices = @transform_1, window_bounds = array<i64: 128, 128>}, {transform_indices = @transform_2, window_bounds = array<i64: 1, 128>}, {transform_indices = @transform_3, window_bounds = array<i64: 1, 128>}, {transform_indices = @transform_4, window_bounds = array<i64: 288, 128>}]} {
    %c0 = arith.constant 0 : index
    %c0_0 = arith.constant 0 : index
    %0 = vector.load %arg2[%c0, %c0_0] : memref<288x128xbf16, #tpu.memory_space<vmem>>, vector<288x128xbf16>
    %c0_1 = arith.constant 0 : index
    %c0_2 = arith.constant 0 : index
    %1 = vector.load %arg3[%c0_1, %c0_2] : memref<128x128xbf16, #tpu.memory_space<vmem>>, vector<128x128xbf16>
    %cst = arith.constant dense<0.000000e+00> : vector<288x128xf32>
    %2 = tpu.matmul %0, %1, %cst {dimension_numbers = #tpu.dot_dimension_numbers<[1], [0], [0], [1], [0, 0, 1, 1], [], []>} : vector<288x128xbf16>, vector<128x128xbf16>, vector<288x128xf32> -> vector<288x128xf32>
    %c0_3 = arith.constant 0 : index
    %c0_4 = arith.constant 0 : index
    %3 = vector.load %arg4[%c0_3, %c0_4] : memref<1x128xf32, #tpu.memory_space<vmem>>, vector<1x128xf32>
    %4 = vector.broadcast %3 : vector<1x128xf32> to vector<288x128xf32>
    %5 = arith.mulf %2, %4 : vector<288x128xf32>
    %c0_5 = arith.constant 0 : index
    %c0_6 = arith.constant 0 : index
    %6 = vector.load %arg5[%c0_5, %c0_6] : memref<1x128xf32, #tpu.memory_space<vmem>>, vector<1x128xf32>
    %7 = vector.broadcast %6 : vector<1x128xf32> to vector<288x128xf32>
    %8 = arith.addf %5, %7 : vector<288x128xf32>
    %9 = arith.truncf %8 : vector<288x128xf32> to vector<288x128xbf16>
    %c0_7 = arith.constant 0 : index
    %c0_8 = arith.constant 0 : index
    %10 = vector.load %arg6[%c0_7, %c0_8] : memref<288x128xbf16, #tpu.memory_space<vmem>>, vector<288x128xbf16>
    tpu.vector_store %arg6[%c0_7, %c0_8], %9 {strides = array<i32>} : memref<288x128xbf16, #tpu.memory_space<vmem>>, vector<288x128xbf16>,
    return
  }
  func.func @transform_0(%arg0: i32, %arg1: i32) -> (i32, i32) {
    %c0_i32 = arith.constant 0 : i32
    %c0_i32_0 = arith.constant 0 : i32
    return %arg0, %c0_i32 : i32, i32
  }
  func.func @transform_1(%arg0: i32, %arg1: i32) -> (i32, i32) {
    %c0_i32 = arith.constant 0 : i32
    %c0_i32_0 = arith.constant 0 : i32
    return %c0_i32, %arg1 : i32, i32
  }
  func.func @transform_2(%arg0: i32, %arg1: i32) -> (i32, i32) {
    %c0_i32 = arith.constant 0 : i32
    %c0_i32_0 = arith.constant 0 : i32
    return %c0_i32, %arg1 : i32, i32
  }
  func.func @transform_3(%arg0: i32, %arg1: i32) -> (i32, i32) {
    %c0_i32 = arith.constant 0 : i32
    %c0_i32_0 = arith.constant 0 : i32
    return %c0_i32, %arg1 : i32, i32
  }
  func.func @transform_4(%arg0: i32, %arg1: i32) -> (i32, i32) {
    %c0_i32 = arith.constant 0 : i32
    return %arg0, %arg1 : i32, i32
  }
}

</mosaic_0001>

<bundles_post_ra>
// kernel: tpu_custom_call.1
= control target key start
LH: loop header
LB: loop body
LE: loop exit
PB: predicated region body
PF: predicated region fallthrough
CT: control target
= control target key end

     0   :  { %9 = vsyncpa [#allocation3], 0  ;;  %s1277_s0 = inlined_call_operand.hbm [shape: bf16[288,128], index: 0, kind: input, shape index: {}]   ;;  %s1278_s1 = inlined_call_operand.hbm [shape: bf16[128,128], index: 1, kind: input, shape index: {}]   ;;  %s1279_s2 = inlined_call_operand.vmem [shape: f32[1,128], index: 2, kind: input, shape index: {}]   ;;  %s1280_s3 = inlined_call_operand.vmem [shape: f32[1,128], index: 3, kind: input, shape index: {}]   ;;  %s1281_s4 = inlined_call_operand.hbm [shape: bf16[288,128], index: 4, kind: output, shape index: {}]  }
   0x1   :  { %10 = vsyncpa [#allocation6], 0 }
   0x2   :  { %11 = vsyncpa [#allocation4], 0  ;;  %s1120_s15 = smov [#allocation2]   ;;  %s1048_s19 = scalar_lea.hbm %s1277_s0, 2304 }
   0x3   :  { %s17_s16 = sshll.u32 %s1120_s15, 4  ;;  %p1049_p0 = scmp.ne.s32.totalorder %s1277_s0, %s1048_s19  ;;  %s18_s16 = int_to_ptr.vmem [resolvable:$true] %s17_s16 }
   0x4   :  { %p1052_p1 = scmp.lt.u32.totalorder %s1048_s19, %s1277_s0 }
   0x6   :  { %p1054_p2 = pnand %p1052_p1, %p1049_p0 }
   0x8   :  { %1057 = shalt.err (!%p1054_p2)
}
   0x9   :  { %s1058_s24 = scalar_lea.vmem %s18_s16, 2304  ;;  %p1063_p4 = scmp.lt.s32.totalorder %s18_s16, %s18_s16 }
   0xa   :  { %p1059_p3 = scmp.ne.s32.totalorder %s18_s16, %s1058_s24  ;;  %p1064_p5 = scmp.lt.s32.totalorder %s1058_s24, %s1058_s24 }
   0xc   :  { %p1065_p6 = por %p1064_p5, %p1063_p4 }
   0xe   :  { %p1066_p7 = pnand %p1065_p6, %p1059_p3 }
  0x10   :  { %1069 = shalt.err (!%p1066_p7)
}
  0x11   :  { %s1121_s25 = smov 64   ;;  %s1122_s26 = smov 4  }
  0x12   :  { %23 = dma.hbm_to_vmem [thread:$0]  %s1277_s0, 2304, %s18_s16, [#allocation3], %s1121_s25, %s1121_s25, %s1122_s26  }
  0x13   :  { %s1123_s29 = smov [#allocation5]   ;;  %s1070_s7 = scalar_lea.hbm %s1278_s1, 1024 }
  0x14   :  { %s29_s30 = sshll.u32 %s1123_s29, 4  ;;  %p1071_p8 = scmp.ne.s32.totalorder %s1278_s1, %s1070_s7  ;;  %s30_s30 = int_to_ptr.vmem [resolvable:$true] %s29_s30 }
  0x15   :  { %p1074_p9 = scmp.lt.u32.totalorder %s1070_s7, %s1278_s1 }
  0x17   :  { %p1076_p10 = pnand %p1074_p9, %p1071_p8 }
  0x19   :  { %1079 = shalt.err (!%p1076_p10)
}
  0x1a   :  { %s1080_s12 = scalar_lea.vmem %s30_s30, 1024  ;;  %p1085_p12 = scmp.lt.s32.totalorder %s30_s30, %s30_s30 }
  0x1b   :  { %p1081_p11 = scmp.ne.s32.totalorder %s30_s30, %s1080_s12  ;;  %p1086_p13 = scmp.lt.s32.totalorder %s1080_s12, %s1080_s12 }
  0x1d   :  { %p1087_p0 = por %p1086_p13, %p1085_p12 }
  0x1f   :  { %p1088_p1 = pnand %p1087_p0, %p1081_p11 }
  0x21   :  { %1091 = shalt.err (!%p1088_p1)
}
  0x22   :  { %35 = dma.hbm_to_vmem [thread:$0]  %s1278_s1, 1024, %s30_s30, [#allocation6], %s1121_s25, %s1121_s25, %s1122_s26  }
  0x23   :  { %1114 = dma.done.wait [#allocation3], 2304  }
  0x24   :  { %1115 = vsyncadd [#allocation3], 4294964992 }
  0x25   :  { %1116 = dma.done.wait [#allocation6], 1024  }
  0x26   :  { %1117 = vsyncadd [#allocation6], 4294966272  ;;  %v1022_v0 = vld [vmem:[#allocation5] sm:$0xff]   ;;  %v1023_v1 = vld [vmem:[#allocation5 + $0x8] sm:$0xff]  }
  0x27   :  { %949 = vmatprep.subr.bf16.mxu0 %v1022_v0  ;;  %1001 = vmatprep.subr.bf16.mxu1 %v1022_v0  ;;  %v1024_v2 = vld [vmem:[#allocation5 + $0x10] sm:$0xff]   ;;  %v1025_v3 = vld [vmem:[#allocation5 + $0x18] sm:$0xff]   ;;  %v1032_v5 = vld [vmem:[#allocation2 + $0x50] sm:$0xff]  }
  0x28   :  { %950 = vmatpush3.bf16.msra.mxu0 %v1022_v0  ;;  %1009 = vmatpush3.bf16.msra.mxu1 %v1022_v0  ;;  %v1030_v4 = vld [vmem:[#allocation2] sm:$0xff]   ;;  %v1026_v6 = vld [vmem:[#allocation5 + $0x20] sm:$0xff]   ;;  %v1027_v7 = vld [vmem:[#allocation5 + $0x28] sm:$0xff]  }
  0x29   :  { %951 = vmatprep.subr.bf16.mxu0 %v1023_v1  ;;  %1002 = vmatprep.subr.bf16.mxu1 %v1023_v1  ;;  %v1028_v8 = vld [vmem:[#allocation5 + $0x30] sm:$0xff]   ;;  %v1029_v9 = vld [vmem:[#allocation5 + $0x38] sm:$0xff]   ;;  %v1033_v11 = vld [vmem:[#allocation2 + $0x58] sm:$0xff]  }
  0x2a   :  { %965 = vmatprep.mubr.bf16.mxu0 %v1030_v4  ;;  %985 = vmatprep.mubr.bf16.mxu1 %v1032_v5  ;;  %v1031_v10 = vld [vmem:[#allocation2 + $0x8] sm:$0xff]   ;;  %v1034_v12 = vld [vmem:[#allocation2 + $0x10] sm:$0xff]   ;;  %v1036_v13 = vld [vmem:[#allocation2 + $0x60] sm:$0xff]  }
  0x2b   :  { %v1035_v14 = vld [vmem:[#allocation2 + $0x18] sm:$0xff]   ;;  %v1037_v15 = vld [vmem:[#allocation2 + $0x68] sm:$0xff]   ;;  %v1038_v16 = vld [vmem:[#allocation2 + $0x20] sm:$0xff]  }
  0x2c   :  { %952 = vmatpush3.bf16.msra.mxu0 %v1023_v1  ;;  %1010 = vmatpush3.bf16.msra.mxu1 %v1023_v1  ;;  %v1040_v17 = vld [vmem:[#allocation2 + $0x70] sm:$0xff]   ;;  %v1039_v18 = vld [vmem:[#allocation2 + $0x28] sm:$0xff]   ;;  %v1041_v19 = vld [vmem:[#allocation2 + $0x78] sm:$0xff]  }
  0x2d   :  { %953 = vmatprep.subr.bf16.mxu0 %v1024_v2  ;;  %1003 = vmatprep.subr.bf16.mxu1 %v1024_v2  ;;  %v1042_v20 = vld [vmem:[#allocation2 + $0x30] sm:$0xff]   ;;  %v1044_v21 = vld [vmem:[#allocation2 + $0x80] sm:$0xff]   ;;  %v1043_v22 = vld [vmem:[#allocation2 + $0x38] sm:$0xff]  }
  0x2e   :  { %v1045_v23 = vld [vmem:[#allocation2 + $0x88] sm:$0xff]   ;;  %v1046_v24 = vld [vmem:[#allocation2 + $0x40] sm:$0xff]  }
  0x2f   :  { %v1047_v25 = vld [vmem:[#allocation2 + $0x48] sm:$0xff]   ;;  %v1183_v26 = vld [vmem:[%s1279_s2] ss:$0 sm:$0xff]  ;;  %s1124_s2 = smov [#allocation7]  }
  0x30   :  { %954 = vmatpush3.bf16.msra.mxu0 %v1024_v2  ;;  %1011 = vmatpush3.bf16.msra.mxu1 %v1024_v2  ;;  %v1190_v33 = vld [vmem:[%s1280_s3] ss:$0 sm:$0xff]  ;;  %s703_s3 = sshll.u32 %s1124_s2, 4  ;;  %s704_s3 = int_to_ptr.vmem [resolvable:$true] %s703_s3 }
  0x31   :  { %955 = vmatprep.subr.bf16.mxu0 %v1025_v3  ;;  %1004 = vmatprep.subr.bf16.mxu1 %v1025_v3  ;;  %s1092_s17 = scalar_lea.vmem %s704_s3, 2304  ;;  %p1097_p3 = scmp.lt.s32.totalorder %s704_s3, %s704_s3 }
  0x32   :  { %p1093_p2 = scmp.ne.s32.totalorder %s704_s3, %s1092_s17  ;;  %p1098_p4 = scmp.lt.s32.totalorder %s1092_s17, %s1092_s17 }
  0x34   :  { %956 = vmatpush3.bf16.msra.mxu0 %v1025_v3  ;;  %1012 = vmatpush3.bf16.msra.mxu1 %v1025_v3  ;;  %p1099_p5 = por %p1098_p4, %p1097_p3 }
  0x35   :  { %957 = vmatprep.subr.bf16.mxu0 %v1026_v6  ;;  %1005 = vmatprep.subr.bf16.mxu1 %v1026_v6 }
  0x36   :  { %p1100_p6 = pnand %p1099_p5, %p1093_p2 }
  0x38   :  { %958 = vmatpush3.bf16.msra.mxu0 %v1026_v6  ;;  %1013 = vmatpush3.bf16.msra.mxu1 %v1026_v6 }
  0x39   :  { %959 = vmatprep.subr.bf16.mxu0 %v1027_v7  ;;  %1006 = vmatprep.subr.bf16.mxu1 %v1027_v7 }
  0x3c   :  { %960 = vmatpush3.bf16.msra.mxu0 %v1027_v7  ;;  %1014 = vmatpush3.bf16.msra.mxu1 %v1027_v7 }
  0x3d   :  { %961 = vmatprep.subr.bf16.mxu0 %v1028_v8  ;;  %1007 = vmatprep.subr.bf16.mxu1 %v1028_v8 }
  0x40   :  { %962 = vmatpush3.bf16.msra.mxu0 %v1028_v8  ;;  %1015 = vmatpush3.bf16.msra.mxu1 %v1028_v8 }
  0x41   :  { %963 = vmatprep.subr.bf16.mxu0 %v1029_v9  ;;  %1008 = vmatprep.subr.bf16.mxu1 %v1029_v9 }
  0x44   :  { %964 = vmatpush3.bf16.msra.mxu0 %v1029_v9  ;;  %1016 = vmatpush3.bf16.msra.mxu1 %v1029_v9 }
  0x47   :  { %966 = vmatmul.mubr.bf16.vlgmr.msra.gmra.mrb[0].mxu0 %v1031_v10  ;;  %986 = vmatmul.mubr.bf16.vlgmr.msra.gmra.mrb[0].mxu1 %v1033_v11 }
  0x48   :  { %969 = vmatprep.mubr.bf16.mxu0 %v1034_v12  ;;  %989 = vmatprep.mubr.bf16.mxu1 %v1036_v13 }
  0x4f   :  { %970 = vmatmul.mubr.bf16.gmra.mrb[4].mxu0 %v1035_v14  ;;  %990 = vmatmul.mubr.bf16.gmra.mrb[4].mxu1 %v1037_v15 }
  0x50   :  { %973 = vmatprep.mubr.bf16.mxu0 %v1038_v16  ;;  %993 = vmatprep.mubr.bf16.mxu1 %v1040_v17 }
  0x57   :  { %974 = vmatmul.mubr.bf16.gmra.mrb[8].mxu0 %v1039_v18  ;;  %994 = vmatmul.mubr.bf16.gmra.mrb[8].mxu1 %v1041_v19 }
  0x58   :  { %977 = vmatprep.mubr.bf16.mxu0 %v1042_v20  ;;  %997 = vmatprep.mubr.bf16.mxu1 %v1044_v21 }
  0x5f   :  { %978 = vmatmul.mubr.bf16.gmra.mrb[12].mxu0 %v1043_v22  ;;  %998 = vmatmul.mubr.bf16.gmra.mrb[12].mxu1 %v1045_v23 }
  0x60   :  { %981 = vmatprep.mubr.bf16.mxu0 %v1046_v24 }
  0x67   :  { %982 = vmatmul.mubr.bf16.gmra.mrb[16].mxu0 %v1047_v25 }
 0x11a   :  { %v967_v27 = vpop.f32.mrb[0].mxu0  ;;  %v987_v28 = vpop.f32.mrb[0].mxu1 }
 0x11b   :  { %v441_v29 = vmul.f32 %v967_v27, %v1183_v26  ;;  %v289_v30 = vpop.f32.mrb[1].mxu0  ;;  %v461_v31 = vmul.f32 %v987_v28, %v1183_v26  ;;  %v369_v32 = vpop.f32.mrb[1].mxu1 }
 0x11c   :  { %v439_v34 = vmul.f32 %v1183_v26, %v289_v30  ;;  %v968_v35 = vpop.f32.mrb[2].mxu0  ;;  %v459_v36 = vmul.f32 %v1183_v26, %v369_v32  ;;  %v988_v37 = vpop.f32.mrb[2].mxu1 }
 0x11d   :  { %v442_v38 = vmul.f32 %v968_v35, %v1183_v26  ;;  %v292_v39 = vpop.f32.mrb[3].mxu0  ;;  %v504_v40 = vadd.f32 %v1190_v33, %v461_v31  ;;  %v462_v41 = vmul.f32 %v988_v37, %v1183_v26  ;;  %v372_v42 = vpop.f32.mrb[3].mxu1  ;;  %v484_v46 = vadd.f32 %v1190_v33, %v441_v29 }
 0x11e   :  { %v440_v43 = vmul.f32 %v1183_v26, %v292_v39  ;;  %v502_v44 = vadd.f32 %v1190_v33, %v459_v36  ;;  %v460_v45 = vmul.f32 %v1183_v26, %v372_v42  ;;  %v482_v49 = vadd.f32 %v1190_v33, %v439_v34 }
 0x11f   :  { %v485_v47 = vadd.f32 %v1190_v33, %v442_v38  ;;  %v505_v48 = vadd.f32 %v1190_v33, %v462_v41 }
 0x120   :  { %v483_v50 = vadd.f32 %v1190_v33, %v440_v43  ;;  %v503_v51 = vadd.f32 %v1190_v33, %v460_v45 }
 0x121   :  { %v824_v52 = vpack.c.bf16 %v485_v47, %v484_v46  ;;  %v874_v53 = vpack.c.bf16 %v505_v48, %v504_v40 }
 0x122   :  { %v819_v54 = vpack.c.bf16 %v483_v50, %v482_v49  ;;  %v971_v55 = vpop.f32.mrb[4].mxu0  ;;  %v869_v56 = vpack.c.bf16 %v503_v51, %v502_v44  ;;  %v991_v57 = vpop.f32.mrb[4].mxu1 }
 0x123   :  { %906 = vst [vmem:[#allocation7 + $0x8] sm:$0xff] %v824_v52   ;;  %916 = vst [vmem:[#allocation7 + $0x58] sm:$0xff] %v874_v53   ;;  %v445_v58 = vmul.f32 %v971_v55, %v1183_v26  ;;  %v305_v59 = vpop.f32.mrb[5].mxu0  ;;  %v465_v60 = vmul.f32 %v991_v57, %v1183_v26  ;;  %v385_v61 = vpop.f32.mrb[5].mxu1 }
 0x124   :  { %820 = vst [vmem:[#allocation7] sm:$0xff] %v819_v54   ;;  %915 = vst [vmem:[#allocation7 + $0x50] sm:$0xff] %v869_v56   ;;  %v443_v62 = vmul.f32 %v1183_v26, %v305_v59  ;;  %v972_v63 = vpop.f32.mrb[6].mxu0  ;;  %v463_v0 = vmul.f32 %v1183_v26, %v385_v61  ;;  %v992_v1 = vpop.f32.mrb[6].mxu1 }
 0x125   :  { %v446_v2 = vmul.f32 %v972_v63, %v1183_v26  ;;  %v308_v3 = vpop.f32.mrb[7].mxu0  ;;  %v508_v4 = vadd.f32 %v1190_v33, %v465_v60  ;;  %v466_v5 = vmul.f32 %v992_v1, %v1183_v26  ;;  %v388_v6 = vpop.f32.mrb[7].mxu1  ;;  %v488_v10 = vadd.f32 %v1190_v33, %v445_v58 }
 0x126   :  { %v444_v7 = vmul.f32 %v1183_v26, %v308_v3  ;;  %v506_v8 = vadd.f32 %v1190_v33, %v463_v0  ;;  %v464_v9 = vmul.f32 %v1183_v26, %v388_v6  ;;  %v486_v13 = vadd.f32 %v1190_v33, %v443_v62 }
 0x127   :  { %v489_v11 = vadd.f32 %v1190_v33, %v446_v2  ;;  %v509_v12 = vadd.f32 %v1190_v33, %v466_v5 }
 0x128   :  { %v487_v14 = vadd.f32 %v1190_v33, %v444_v7  ;;  %v507_v15 = vadd.f32 %v1190_v33, %v464_v9 }
 0x129   :  { %v834_v16 = vpack.c.bf16 %v489_v11, %v488_v10  ;;  %v884_v17 = vpack.c.bf16 %v509_v12, %v508_v4 }
 0x12a   :  { %v829_v18 = vpack.c.bf16 %v487_v14, %v486_v13  ;;  %v975_v19 = vpop.f32.mrb[8].mxu0  ;;  %v879_v20 = vpack.c.bf16 %v507_v15, %v506_v8  ;;  %v995_v21 = vpop.f32.mrb[8].mxu1 }
 0x12b   :  { %908 = vst [vmem:[#allocation7 + $0x18] sm:$0xff] %v834_v16   ;;  %918 = vst [vmem:[#allocation7 + $0x68] sm:$0xff] %v884_v17   ;;  %v449_v22 = vmul.f32 %v975_v19, %v1183_v26  ;;  %v321_v23 = vpop.f32.mrb[9].mxu0  ;;  %v469_v24 = vmul.f32 %v995_v21, %v1183_v26  ;;  %v401_v25 = vpop.f32.mrb[9].mxu1 }
 0x12c   :  { %907 = vst [vmem:[#allocation7 + $0x10] sm:$0xff] %v829_v18   ;;  %917 = vst [vmem:[#allocation7 + $0x60] sm:$0xff] %v879_v20   ;;  %v447_v27 = vmul.f32 %v1183_v26, %v321_v23  ;;  %v976_v28 = vpop.f32.mrb[10].mxu0  ;;  %v467_v29 = vmul.f32 %v1183_v26, %v401_v25  ;;  %v996_v30 = vpop.f32.mrb[10].mxu1 }
 0x12d   :  { %v450_v31 = vmul.f32 %v976_v28, %v1183_v26  ;;  %v324_v32 = vpop.f32.mrb[11].mxu0  ;;  %v512_v34 = vadd.f32 %v1190_v33, %v469_v24  ;;  %v470_v35 = vmul.f32 %v996_v30, %v1183_v26  ;;  %v404_v36 = vpop.f32.mrb[11].mxu1  ;;  %v492_v40 = vadd.f32 %v1190_v33, %v449_v22 }
 0x12e   :  { %v448_v37 = vmul.f32 %v1183_v26, %v324_v32  ;;  %v510_v38 = vadd.f32 %v1190_v33, %v467_v29  ;;  %v468_v39 = vmul.f32 %v1183_v26, %v404_v36  ;;  %v490_v43 = vadd.f32 %v1190_v33, %v447_v27 }
 0x12f   :  { %v493_v41 = vadd.f32 %v1190_v33, %v450_v31  ;;  %v513_v42 = vadd.f32 %v1190_v33, %v470_v35 }
 0x130   :  { %v491_v44 = vadd.f32 %v1190_v33, %v448_v37  ;;  %v511_v45 = vadd.f32 %v1190_v33, %v468_v39 }
 0x131   :  { %v844_v46 = vpack.c.bf16 %v493_v41, %v492_v40  ;;  %v894_v47 = vpack.c.bf16 %v513_v42, %v512_v34 }
 0x132   :  { %v839_v48 = vpack.c.bf16 %v491_v44, %v490_v43  ;;  %v979_v49 = vpop.f32.mrb[12].mxu0  ;;  %v889_v50 = vpack.c.bf16 %v511_v45, %v510_v38  ;;  %v999_v51 = vpop.f32.mrb[12].mxu1 }
 0x133   :  { %910 = vst [vmem:[#allocation7 + $0x28] sm:$0xff] %v844_v46   ;;  %920 = vst [vmem:[#allocation7 + $0x78] sm:$0xff] %v894_v47   ;;  %v453_v52 = vmul.f32 %v979_v49, %v1183_v26  ;;  %v337_v53 = vpop.f32.mrb[13].mxu0  ;;  %v473_v54 = vmul.f32 %v999_v51, %v1183_v26  ;;  %v417_v55 = vpop.f32.mrb[13].mxu1 }
 0x134   :  { %909 = vst [vmem:[#allocation7 + $0x20] sm:$0xff] %v839_v48   ;;  %919 = vst [vmem:[#allocation7 + $0x70] sm:$0xff] %v889_v50   ;;  %v451_v56 = vmul.f32 %v1183_v26, %v337_v53  ;;  %v980_v57 = vpop.f32.mrb[14].mxu0  ;;  %v471_v58 = vmul.f32 %v1183_v26, %v417_v55  ;;  %v1000_v59 = vpop.f32.mrb[14].mxu1 }
 0x135   :  { %v454_v60 = vmul.f32 %v980_v57, %v1183_v26  ;;  %v340_v61 = vpop.f32.mrb[15].mxu0  ;;  %v516_v62 = vadd.f32 %v1190_v33, %v473_v54  ;;  %v474_v63 = vmul.f32 %v1000_v59, %v1183_v26  ;;  %v420_v0 = vpop.f32.mrb[15].mxu1  ;;  %v496_v4 = vadd.f32 %v1190_v33, %v453_v52 }
 0x136   :  { %v452_v1 = vmul.f32 %v1183_v26, %v340_v61  ;;  %v514_v2 = vadd.f32 %v1190_v33, %v471_v58  ;;  %v472_v3 = vmul.f32 %v1183_v26, %v420_v0  ;;  %v494_v7 = vadd.f32 %v1190_v33, %v451_v56 }
 0x137   :  { %v497_v5 = vadd.f32 %v1190_v33, %v454_v60  ;;  %v517_v6 = vadd.f32 %v1190_v33, %v474_v63 }
 0x138   :  { %v495_v8 = vadd.f32 %v1190_v33, %v452_v1  ;;  %v515_v9 = vadd.f32 %v1190_v33, %v472_v3 }
 0x139   :  { %v854_v10 = vpack.c.bf16 %v497_v5, %v496_v4  ;;  %v904_v11 = vpack.c.bf16 %v517_v6, %v516_v62 }
 0x13a   :  { %v849_v12 = vpack.c.bf16 %v495_v8, %v494_v7  ;;  %v983_v13 = vpop.f32.mrb[16].mxu0  ;;  %v899_v14 = vpack.c.bf16 %v515_v9, %v514_v2 }
 0x13b   :  { %912 = vst [vmem:[#allocation7 + $0x38] sm:$0xff] %v854_v10   ;;  %922 = vst [vmem:[#allocation7 + $0x88] sm:$0xff] %v904_v11   ;;  %v457_v15 = vmul.f32 %v983_v13, %v1183_v26  ;;  %v353_v16 = vpop.f32.mrb[17].mxu0 }
 0x13c   :  { %911 = vst [vmem:[#allocation7 + $0x30] sm:$0xff] %v849_v12   ;;  %921 = vst [vmem:[#allocation7 + $0x80] sm:$0xff] %v899_v14   ;;  %v455_v17 = vmul.f32 %v1183_v26, %v353_v16  ;;  %v984_v18 = vpop.f32.mrb[18].mxu0 }
 0x13d   :  { %v458_v19 = vmul.f32 %v984_v18, %v1183_v26  ;;  %v356_v20 = vpop.f32.mrb[19].mxu0  ;;  %v500_v22 = vadd.f32 %v1190_v33, %v457_v15 }
 0x13e   :  { %v456_v21 = vmul.f32 %v1183_v26, %v356_v20  ;;  %v498_v24 = vadd.f32 %v1190_v33, %v455_v17 }
 0x13f   :  { %v501_v23 = vadd.f32 %v1190_v33, %v458_v19 }
 0x140   :  { %v499_v25 = vadd.f32 %v1190_v33, %v456_v21 }
 0x141   :  { %v864_v27 = vpack.c.bf16 %v501_v23, %v500_v22 }
 0x142   :  { %v859_v28 = vpack.c.bf16 %v499_v25, %v498_v24 }
 0x143   :  { %914 = vst [vmem:[#allocation7 + $0x48] sm:$0xff] %v864_v27  }
 0x144   :  { %913 = vst [vmem:[#allocation7 + $0x40] sm:$0xff] %v859_v28  }
 0x145   :  { %1103 = shalt.err (!%p1100_p6)
}
 0x146   :  { %s1104_s20 = scalar_lea.hbm %s1281_s4, 2304 }
 0x147   :  { %p1105_p7 = scmp.ne.s32.totalorder %s1281_s4, %s1104_s20  ;;  %p1108_p8 = scmp.lt.u32.totalorder %s1104_s20, %s1281_s4 }
 0x149   :  { %p1110_p9 = pnand %p1108_p8, %p1105_p7 }
 0x14b   :  { %1113 = shalt.err (!%p1110_p9)
}
 0x14c   :  { %709 = dma.vmem_to_hbm [thread:$0]  %s704_s3, 2304, %s1281_s4, [#allocation4], %s1121_s25, %s1121_s25, %s1122_s26  }
 0x14d   :  { %1118 = dma.done.wait [#allocation4], 2304  }
 0x14e   :  { %1119 = vsyncadd [#allocation4], 4294964992 }
 0x14f   :  { %713 = vsyncpa [#allocation3], 1 }
 0x150   :  { %714 = vsyncpa [#allocation6], 1 }
 0x151   :  { %715 = vsyncpa [#allocation4], 1 }

</bundles_post_ra>
